<compile_context>
chip_gen: v5e
topology: v5e:2x2
jax: 0.10.0
libtpu: 0.0.40
codegen_flags: <defaults>
</compile_context>

<pallas_src>
import math

import jax
import jax.numpy as jnp
from jax.experimental import pallas as pl
from jax.experimental.pallas import tpu as pltpu

_LOG_2PI = math.log(2.0 * math.pi)


def _prior_logp_kernel(batch_ref, zx_ref, zh_ref, out_ref, r_ref, acc_ref):
    """Fused segmented Gaussian-prior reduction (graphs on lanes).

    Grid: (graph_blocks, node_blocks); node axis is the reduction axis.
      batch_ref: (1, tm)      int32  graph id per node (-1 marks padding)
      zx_ref:    (n_dim, tm)         positions, lane-dense
      zh_ref:    (n_feat, tm)        node features, lane-dense
      out_ref:   (1, tb)      f32    per-graph log p(z_x) + log p(z_h)
      r_ref:     (c, tm)      f32    scratch: packed RHS^T [zx ; ||x||^2+||h||^2 ; 1]
      acc_ref:   (c, tb)      f32    scratch: running [sum_x ; sum_sq ; count]
    with c = n_dim + 2.
    """
    bi = pl.program_id(0)
    ni = pl.program_id(1)

    n_dim, tm = zx_ref.shape
    n_feat = zh_ref.shape[0]
    tb = out_ref.shape[1]

    @pl.when(ni == 0)
    def _init():
        acc_ref[...] = jnp.zeros_like(acc_ref)
        # Constant count row of the packed RHS; scratch persists across the
        # node steps of this graph block, so write it only once.
        r_ref[n_dim + 1:n_dim + 2, :] = jnp.ones((1, tm), jnp.float32)

    zx = zx_ref[...].astype(jnp.float32)          # (n_dim, tm)
    zh = zh_ref[...].astype(jnp.float32)          # (n_feat, tm)

    # Per-node squared norm: a few full-width row adds on the VPU.
    q = (jnp.sum(zx * zx, axis=0, keepdims=True)
         + jnp.sum(zh * zh, axis=0, keepdims=True))            # (1, tm)

    # Packed RHS^T rows -> full-lane-width sublane-row stores (no masked
    # column stores).
    r_ref[0:n_dim, :] = zx
    r_ref[n_dim:n_dim + 1, :] = q

    # One-hot membership with nodes on sublanes and graphs on lanes.  The
    # (1, tm) batch row needs one lane->sublane relayout; do it on a full
    # (8, tm) tile (the canonical aligned transpose case) and keep lane 0.
    # Graph ids are integer-exact in f32 (< 2^24 graphs).
    batch_f = batch_ref[...].astype(jnp.float32)                # (1, tm)
    batch_col = jnp.transpose(
        jnp.broadcast_to(batch_f, (8, tm)), (1, 0))[:, 0:1]     # (tm, 1)
    graph_ids = (jax.lax.broadcasted_iota(jnp.int32, (tm, tb), 1)
                 + bi * tb).astype(jnp.float32)                 # (tm, tb)
    # Padded nodes carry id -1 and padded graph columns match no real node,
    # so both drop out of the matmul.
    onehot = (graph_ids == batch_col).astype(jnp.float32)       # (tm, tb)

    # All four segmented reductions (sum_x, sum||x||^2+||h||^2, counts) in one
    # MXU pass: (c, tm) @ (tm, tb) -> (c, tb).
    acc_ref[...] += jnp.dot(r_ref[...], onehot,
                            preferred_element_type=jnp.float32)

    @pl.when(ni == pl.num_programs(1) - 1)
    def _finalize():
        acc = acc_ref[...]                           # (c, tb)
        sum_x = acc[0:n_dim, :]                      # (n_dim, tb)
        s2 = acc[n_dim:n_dim + 1, :]                 # (1, tb)  sum ||x||^2+||h||^2
        counts = acc[n_dim + 1:n_dim + 2, :]         # (1, tb)  N_b
        safe = jnp.maximum(counts, 1.0)
        # sum_i ||x_i - mu_b||^2 = sum ||x_i||^2 - ||sum_i x_i||^2 / N_b
        # (one-pass centering; fine for ~N(0,1) latents)
        centered = s2 - jnp.sum(sum_x * sum_x, axis=0, keepdims=True) / safe
        dof = (counts - 1.0) * n_dim + counts * n_feat
        out_ref[...] = (-0.5 * centered - 0.5 * dof * _LOG_2PI).astype(out_ref.dtype)


def _round_up(x, m):
    return ((x + m - 1) // m) * m


class PositionFeaturePriorPFM:
    """JAX/Pallas port of PositionFeaturePrior_PFM (no learnable parameters)."""

    def __init__(self, n_dim, in_node_nf):
        self.n_dim = n_dim
        self.in_node_nf = in_node_nf

    def forward(self, z_x, z_h, batch, num_graphs, *,
                block_nodes=1024, block_graphs=512):
        n_nodes, n_dim = z_x.shape
        assert n_dim == self.n_dim
        assert z_h.shape == (n_nodes, self.in_node_nf)
        n_feat = self.in_node_nf

        # Node tile: all node-indexed streams are lane-dense -> tm mult of 128.
        tm = min(_round_up(max(block_nodes, 128), 128), _round_up(n_nodes, 128))
        n_pad = _round_up(n_nodes, tm)

        # Graph tile: graphs live on lanes -> tb mult of 128.  A single graph
        # block (grid[0] == 1) means the node stream is read from HBM once.
        tb = min(_round_up(num_graphs, 128),
                 _round_up(max(block_graphs, 128), 128))
        b_pad = _round_up(num_graphs, tb)

        # NOTE: batch ids must lie in [0, num_graphs); ids >= b_pad would be
        # silently dropped by the one-hot.
        batch_i = batch.astype(jnp.int32)
        zx_t = jnp.transpose(z_x)                 # (n_dim, n_nodes) lane-dense
        zh_t = jnp.transpose(z_h)                 # (n_feat, n_nodes)
        if n_pad != n_nodes:
            pad = n_pad - n_nodes
            batch_i = jnp.pad(batch_i, (0, pad), constant_values=-1)
            zx_t = jnp.pad(zx_t, ((0, 0), (0, pad)))
            zh_t = jnp.pad(zh_t, ((0, 0), (0, pad)))
        batch2d = batch_i.reshape(1, n_pad)

        grid = (b_pad // tb, n_pad // tm)
        c = n_dim + 2
        cost = pl.CostEstimate(
            flops=int(2 * c * n_pad * b_pad),
            transcendentals=0,
            bytes_accessed=int(
                grid[0] * n_pad * (n_dim * z_x.dtype.itemsize
                                   + n_feat * z_h.dtype.itemsize + 4)
                + b_pad * 4),
        )

        out = pl.pallas_call(
            _prior_logp_kernel,
            out_shape=jax.ShapeDtypeStruct((1, b_pad), jnp.float32),
            grid_spec=pltpu.PrefetchScalarGridSpec(
                num_scalar_prefetch=0,
                grid=grid,
                in_specs=[
                    pl.BlockSpec((1, tm), lambda bi, ni: (0, ni)),       # batch
                    pl.BlockSpec((n_dim, tm), lambda bi, ni: (0, ni)),   # z_x^T
                    pl.BlockSpec((n_feat, tm), lambda bi, ni: (0, ni)),  # z_h^T
                ],
                out_specs=pl.BlockSpec((1, tb), lambda bi, ni: (0, bi)),
                scratch_shapes=[
                    pltpu.VMEM((c, tm), jnp.float32),   # packed per-tile RHS^T
                    pltpu.VMEM((c, tb), jnp.float32),   # per-graph accumulator
                ],
            ),
            compiler_params=pltpu.CompilerParams(
                dimension_semantics=("parallel", "arbitrary"),
                vmem_limit_bytes=32 * 1024 * 1024,
            ),
            cost_estimate=cost,
        )(batch2d, zx_t, zh_t)

        # Padded graph columns hold garbage (counts == 0); never expose them.
        return out[0, :num_graphs]                       # (num_graphs,)

    __call__ = forward


def _reference_logp(z_x, z_h, batch, num_graphs, n_dim, n_feat):
    """Pure-JAX two-pass reference for validation."""
    z_x = z_x.astype(jnp.float32)
    z_h = z_h.astype(jnp.float32)
    ones = jnp.ones((z_x.shape[0],), jnp.float32)
    counts = jax.ops.segment_sum(ones, batch, num_segments=num_graphs)
    sum_x = jax.ops.segment_sum(z_x, batch, num_segments=num_graphs)
    mu = sum_x / jnp.maximum(counts, 1.0)[:, None]
    xc = z_x - mu[batch]
    sq_x = jax.ops.segment_sum(jnp.sum(xc * xc, axis=1), batch,
                               num_segments=num_graphs)
    sq_h = jax.ops.segment_sum(jnp.sum(z_h * z_h, axis=1), batch,
                               num_segments=num_graphs)
    log_px = -0.5 * sq_x - 0.5 * (counts - 1.0) * n_dim * _LOG_2PI
    log_ph = -0.5 * sq_h - 0.5 * counts * n_feat * _LOG_2PI
    return log_px + log_ph


if __name__ == "__main__":
    n_dim = 3          # spatial dimensions
    in_node_nf = 4     # node feature size
    prior = PositionFeaturePriorPFM(n_dim=n_dim, in_node_nf=in_node_nf)

    key = jax.random.PRNGKey(0)
    k1, k2, k3, k4, k5 = jax.random.split(key, 5)

    # --- Test 1: small, sorted batch (2 graphs x 4 nodes), single tile ---
    num_graphs = 2
    n_nodes = 8
    z_x = jax.random.normal(k1, (n_nodes, n_dim), dtype=jnp.float32)
    z_h = jax.random.normal(k2, (n_nodes, in_node_nf), dtype=jnp.float32)
    batch = jnp.repeat(jnp.arange(num_graphs, dtype=jnp.int32),
                       n_nodes // num_graphs)
    log_pz = prior(z_x, z_h, batch, num_graphs)
    jax.block_until_ready(log_pz)
    ref = _reference_logp(z_x, z_h, batch, num_graphs, n_dim, in_node_nf)
    assert log_pz.shape == (num_graphs,)
    assert jnp.allclose(log_pz, ref, rtol=1e-4, atol=1e-3), (log_pz, ref)

    # --- Test 2: multiple node blocks AND graph blocks, unsorted batch ---
    num_graphs = 200
    n_nodes = 300
    z_x = jax.random.normal(k3, (n_nodes, n_dim), dtype=jnp.float32)
    z_h = jax.random.normal(k4, (n_nodes, in_node_nf), dtype=jnp.float32)
    batch = jax.random.randint(k5, (n_nodes,), 0, num_graphs, dtype=jnp.int32)
    log_pz = prior.forward(z_x, z_h, batch, num_graphs,
                           block_nodes=128, block_graphs=128)
    jax.block_until_ready(log_pz)
    ref = _reference_logp(z_x, z_h, batch, num_graphs, n_dim, in_node_nf)
    assert log_pz.shape == (num_graphs,)
    assert jnp.allclose(log_pz, ref, rtol=1e-4, atol=1e-3), (log_pz, ref)

    print("KERNEL_OK")
</pallas_src>

<mosaic_0001>
module attributes {stable_mosaic.version = 11 : i64} {
  func.func @_prior_logp_kernel(%arg0: i32, %arg1: i32, %arg2: memref<1x128xi32, #tpu.memory_space<vmem>>, %arg3: memref<3x128xf32, #tpu.memory_space<vmem>>, %arg4: memref<4x128xf32, #tpu.memory_space<vmem>>, %arg5: memref<1x128xf32, #tpu.memory_space<vmem>>, %arg6: memref<5x128xf32, #tpu.memory_space<vmem>>, %arg7: memref<5x128xf32, #tpu.memory_space<vmem>>) attributes {dimension_semantics = [#tpu.dimension_semantics<parallel>, #tpu.dimension_semantics<arbitrary>], iteration_bounds = array<i64: 1, 1>, scalar_prefetch = 0 : i64, scratch_operands = 2 : i64, tpu.core_type = #tpu.core_type<tc>, window_params = [{transform_indices = @transform_0, window_bounds = array<i64: 1, 128>}, {transform_indices = @transform_1, window_bounds = array<i64: 3, 128>}, {transform_indices = @transform_2, window_bounds = array<i64: 4, 128>}, {transform_indices = @transform_3, window_bounds = array<i64: 1, 128>}]} {
    %c0_i32 = arith.constant 0 : i32
    %0 = arith.cmpi eq, %arg1, %c0_i32 : i32
    %1 = arith.extui %0 : i1 to i32
    %c0_i32_0 = arith.constant 0 : i32
    %2 = arith.cmpi ne, %1, %c0_i32_0 : i32
    scf.if %2 {
      %cst_19 = arith.constant 0.000000e+00 : f32
      %37 = vector.broadcast %cst_19 : f32 to vector<5x128xf32>
      %c0_20 = arith.constant 0 : index
      %c0_21 = arith.constant 0 : index
      %38 = vector.load %arg7[%c0_20, %c0_21] : memref<5x128xf32, #tpu.memory_space<vmem>>, vector<5x128xf32>
      tpu.vector_store %arg7[%c0_20, %c0_21], %37 {strides = array<i32>} : memref<5x128xf32, #tpu.memory_space<vmem>>, vector<5x128xf32>,
      %cst_22 = arith.constant 1.000000e+00 : f32
      %39 = vector.broadcast %cst_22 : f32 to vector<1x128xf32>
      %c4 = arith.constant 4 : index
      %c0_23 = arith.constant 0 : index
      %40 = vector.load %arg6[%c4, %c0_23] : memref<5x128xf32, #tpu.memory_space<vmem>>, vector<1x128xf32>
      tpu.vector_store %arg6[%c4, %c0_23], %39 {strides = array<i32>} : memref<5x128xf32, #tpu.memory_space<vmem>>, vector<1x128xf32>,
    } else {
    }
    %c0 = arith.constant 0 : index
    %c0_1 = arith.constant 0 : index
    %3 = vector.load %arg3[%c0, %c0_1] : memref<3x128xf32, #tpu.memory_space<vmem>>, vector<3x128xf32>
    %c0_2 = arith.constant 0 : index
    %c0_3 = arith.constant 0 : index
    %4 = vector.load %arg4[%c0_2, %c0_3] : memref<4x128xf32, #tpu.memory_space<vmem>>, vector<4x128xf32>
    %5 = arith.mulf %3, %3 : vector<3x128xf32>
    %cst = arith.constant dense<0.000000e+00> : vector<128xf32>
    %6 = vector.multi_reduction <add>, %5, %cst [0] : vector<3x128xf32> to vector<128xf32>
    %7 = vector.shape_cast %6 : vector<128xf32> to vector<1x128xf32>
    %8 = arith.mulf %4, %4 : vector<4x128xf32>
    %cst_4 = arith.constant dense<0.000000e+00> : vector<128xf32>
    %9 = vector.multi_reduction <add>, %8, %cst_4 [0] : vector<4x128xf32> to vector<128xf32>
    %10 = vector.shape_cast %9 : vector<128xf32> to vector<1x128xf32>
    %11 = arith.addf %7, %10 : vector<1x128xf32>
    %c0_5 = arith.constant 0 : index
    %c0_6 = arith.constant 0 : index
    %12 = vector.load %arg6[%c0_5, %c0_6] : memref<5x128xf32, #tpu.memory_space<vmem>>, vector<3x128xf32>
    tpu.vector_store %arg6[%c0_5, %c0_6], %3 {strides = array<i32>} : memref<5x128xf32, #tpu.memory_space<vmem>>, vector<3x128xf32>,
    %c3 = arith.constant 3 : index
    %c0_7 = arith.constant 0 : index
    %13 = vector.load %arg6[%c3, %c0_7] : memref<5x128xf32, #tpu.memory_space<vmem>>, vector<1x128xf32>
    tpu.vector_store %arg6[%c3, %c0_7], %11 {strides = array<i32>} : memref<5x128xf32, #tpu.memory_space<vmem>>, vector<1x128xf32>,
    %c0_8 = arith.constant 0 : index
    %c0_9 = arith.constant 0 : index
    %14 = vector.load %arg2[%c0_8, %c0_9] : memref<1x128xi32, #tpu.memory_space<vmem>>, vector<1x128xi32>
    %15 = arith.sitofp %14 : vector<1x128xi32> to vector<1x128xf32>
    %16 = vector.shape_cast %15 : vector<1x128xf32> to vector<1x128xf32>
    %17 = vector.broadcast %16 : vector<1x128xf32> to vector<8x128xf32>
    %18 = tpu.transpose %17, [1, 0] : vector<8x128xf32> -> vector<128x8xf32>
    %19 = vector.extract_strided_slice %18 {offsets = [0, 0], sizes = [128, 1], strides = [1, 1]} : vector<128x8xf32> to vector<128x1xf32>
    %20 = tpu.iota {dimensions = array<i32: 1>} : vector<128x128xi32>
    %c128_i32 = arith.constant 128 : i32
    %21 = arith.muli %arg0, %c128_i32 : i32
    %22 = vector.broadcast %21 : i32 to vector<128x128xi32>
    %23 = arith.addi %20, %22 : vector<128x128xi32>
    %24 = arith.sitofp %23 : vector<128x128xi32> to vector<128x128xf32>
    %25 = vector.broadcast %19 : vector<128x1xf32> to vector<128x128xf32>
    %26 = arith.cmpf oeq, %24, %25 : vector<128x128xf32>
    %27 = arith.extui %26 : vector<128x128xi1> to vector<128x128xi32>
    %28 = arith.sitofp %27 : vector<128x128xi32> to vector<128x128xf32>
    %c0_10 = arith.constant 0 : index
    %c0_11 = arith.constant 0 : index
    %29 = vector.load %arg7[%c0_10, %c0_11] : memref<5x128xf32, #tpu.memory_space<vmem>>, vector<5x128xf32>
    %c0_12 = arith.constant 0 : index
    %c0_13 = arith.constant 0 : index
    %30 = vector.load %arg6[%c0_12, %c0_13] : memref<5x128xf32, #tpu.memory_space<vmem>>, vector<5x128xf32>
    %cst_14 = arith.constant dense<0.000000e+00> : vector<5x128xf32>
    %31 = tpu.matmul %30, %28, %cst_14 {dimension_numbers = #tpu.dot_dimension_numbers<[1], [0], [0], [1], [0, 0, 1, 1], [], []>} : vector<5x128xf32>, vector<128x128xf32>, vector<5x128xf32> -> vector<5x128xf32>
    %32 = arith.addf %29, %31 : vector<5x128xf32>
    %c0_15 = arith.constant 0 : index
    %c0_16 = arith.constant 0 : index
    %33 = vector.load %arg7[%c0_15, %c0_16] : memref<5x128xf32, #tpu.memory_space<vmem>>, vector<5x128xf32>
    tpu.vector_store %arg7[%c0_15, %c0_16], %32 {strides = array<i32>} : memref<5x128xf32, #tpu.memory_space<vmem>>, vector<5x128xf32>,
    %c0_i32_17 = arith.constant 0 : i32
    %34 = arith.cmpi eq, %arg1, %c0_i32_17 : i32
    %35 = arith.extui %34 : i1 to i32
    %c0_i32_18 = arith.constant 0 : i32
    %36 = arith.cmpi ne, %35, %c0_i32_18 : i32
    scf.if %36 {
      %c0_19 = arith.constant 0 : index
      %c0_20 = arith.constant 0 : index
      %37 = vector.load %arg7[%c0_19, %c0_20] : memref<5x128xf32, #tpu.memory_space<vmem>>, vector<5x128xf32>
      %38 = vector.extract_strided_slice %37 {offsets = [0, 0], sizes = [3, 128], strides = [1, 1]} : vector<5x128xf32> to vector<3x128xf32>
      %39 = vector.extract_strided_slice %37 {offsets = [3, 0], sizes = [1, 128], strides = [1, 1]} : vector<5x128xf32> to vector<1x128xf32>
      %40 = vector.extract_strided_slice %37 {offsets = [4, 0], sizes = [1, 128], strides = [1, 1]} : vector<5x128xf32> to vector<1x128xf32>
      %cst_21 = arith.constant 1.000000e+00 : f32
      %41 = vector.broadcast %cst_21 : f32 to vector<1x128xf32>
      %42 = arith.maximumf %40, %41 : vector<1x128xf32>
      %43 = arith.mulf %38, %38 : vector<3x128xf32>
      %cst_22 = arith.constant dense<0.000000e+00> : vector<128xf32>
      %44 = vector.multi_reduction <add>, %43, %cst_22 [0] : vector<3x128xf32> to vector<128xf32>
      %45 = vector.shape_cast %44 : vector<128xf32> to vector<1x128xf32>
      %46 = arith.divf %45, %42 : vector<1x128xf32>
      %47 = arith.subf %39, %46 : vector<1x128xf32>
      %cst_23 = arith.constant 1.000000e+00 : f32
      %48 = vector.broadcast %cst_23 : f32 to vector<1x128xf32>
      %49 = arith.subf %40, %48 : vector<1x128xf32>
      %cst_24 = arith.constant 3.000000e+00 : f32
      %50 = vector.broadcast %cst_24 : f32 to vector<1x128xf32>
      %51 = arith.mulf %49, %50 : vector<1x128xf32>
      %cst_25 = arith.constant 4.000000e+00 : f32
      %52 = vector.broadcast %cst_25 : f32 to vector<1x128xf32>
      %53 = arith.mulf %40, %52 : vector<1x128xf32>
      %54 = arith.addf %51, %53 : vector<1x128xf32>
      %cst_26 = arith.constant -5.000000e-01 : f32
      %55 = vector.broadcast %cst_26 : f32 to vector<1x128xf32>
      %56 = arith.mulf %55, %47 : vector<1x128xf32>
      %cst_27 = arith.constant 5.000000e-01 : f32
      %57 = vector.broadcast %cst_27 : f32 to vector<1x128xf32>
      %58 = arith.mulf %57, %54 : vector<1x128xf32>
      %cst_28 = arith.constant 1.83787704 : f32
      %59 = vector.broadcast %cst_28 : f32 to vector<1x128xf32>
      %60 = arith.mulf %58, %59 : vector<1x128xf32>
      %61 = arith.subf %56, %60 : vector<1x128xf32>
      %c0_29 = arith.constant 0 : index
      %c0_30 = arith.constant 0 : index
      %62 = vector.load %arg5[%c0_29, %c0_30] : memref<1x128xf32, #tpu.memory_space<vmem>>, vector<1x128xf32>
      tpu.vector_store %arg5[%c0_29, %c0_30], %61 {strides = array<i32>} : memref<1x128xf32, #tpu.memory_space<vmem>>, vector<1x128xf32>,
    } else {
    }
    return
  }
  func.func @transform_0(%arg0: i32, %arg1: i32) -> (i32, i32) {
    %c0_i32 = arith.constant 0 : i32
    %c0_i32_0 = arith.constant 0 : i32
    return %c0_i32, %arg1 : i32, i32
  }
  func.func @transform_1(%arg0: i32, %arg1: i32) -> (i32, i32) {
    %c0_i32 = arith.constant 0 : i32
    %c0_i32_0 = arith.constant 0 : i32
    return %c0_i32, %arg1 : i32, i32
  }
  func.func @transform_2(%arg0: i32, %arg1: i32) -> (i32, i32) {
    %c0_i32 = arith.constant 0 : i32
    %c0_i32_0 = arith.constant 0 : i32
    return %c0_i32, %arg1 : i32, i32
  }
  func.func @transform_3(%arg0: i32, %arg1: i32) -> (i32, i32) {
    %c0_i32 = arith.constant 0 : i32
    %c0_i32_0 = arith.constant 0 : i32
    return %c0_i32, %arg0 : i32, i32
  }
}

</mosaic_0001>

<bundles_post_ra>
// kernel: tpu_custom_call.1
= control target key start
LH: loop header
LB: loop body
LE: loop exit
PB: predicated region body
PF: predicated region fallthrough
CT: control target
= control target key end

     0   :  { %8 = vsyncpa [#allocation5], 0  ;;  %s547_s0 = inlined_call_operand.hbm [shape: s32[1,128], index: 0, kind: input, shape index: {}]   ;;  %s548_s1 = inlined_call_operand.hbm [shape: f32[3,128], index: 1, kind: input, shape index: {}]   ;;  %s549_s2 = inlined_call_operand.hbm [shape: f32[4,128], index: 2, kind: input, shape index: {}]   ;;  %s550_s3 = inlined_call_operand.hbm [shape: f32[1,128], index: 3, kind: output, shape index: {}]  }
   0x1   :  { %9 = vsyncpa [#allocation8], 0  ;;  %s27_s14 = sshll.u32 %s548_s1, 4  ;;  %s28_s14 = int_to_ptr.hbm [resolvable:$true] %s27_s14 }
   0x2   :  { %10 = vsyncpa [#allocation6], 0  ;;  %s489_s15 = smov [#allocation7]   ;;  %s16_s19 = sshll.u32 %s547_s0, 4  ;;  %s17_s19 = int_to_ptr.hbm [resolvable:$true] %s16_s19 }
   0x3   :  { %s29_s16 = sshll.u32 %s489_s15, 4  ;;  %s490_s20 = smov [#allocation4]   ;;  %s30_s16 = int_to_ptr.vmem [resolvable:$true] %s29_s16 }
   0x4   :  { %32 = dma.hbm_to_vmem [thread:$0]  %s28_s14, 64, %s30_s16, [#allocation8]  }
   0x5   :  { %s18_s21 = sshll.u32 %s490_s20, 4  ;;  %s38_s24 = sshll.u32 %s549_s2, 4  ;;  %s19_s21 = int_to_ptr.vmem [resolvable:$true] %s18_s21  ;;  %s39_s24 = int_to_ptr.hbm [resolvable:$true] %s38_s24 }
   0x6   :  { %21 = dma.hbm_to_vmem [thread:$0]  %s17_s19, 16, %s19_s21, [#allocation5]  }
   0x7   :  { %s491_s1 = smov [#allocation9]  }
   0x8   :  { %s40_s25 = sshll.u32 %s491_s1, 4  ;;  %s41_s25 = int_to_ptr.vmem [resolvable:$true] %s40_s25 }
   0x9   :  { %43 = dma.hbm_to_vmem [thread:$0]  %s39_s24, 64, %s41_s25, [#allocation8]  }
   0xa   :  { %483 = dma.done.wait [#allocation5], 16  }
   0xb   :  { %484 = vsyncadd [#allocation5], 4294967280 }
   0xc   :  { %485 = dma.done.wait [#allocation8], 128  }
   0xd   :  { %486 = vsyncadd [#allocation8], 4294967168  ;;  %v85_v0 = vld [vmem:[#allocation4] sm:$0x1]  ;;  %v492_v11 = vmov 0   ;;  %v493_v20 = vmov 1.0   ;;  %v122_v23 = vlaneseq }
   0xe   :  { %v86_v1 = vcvt.s32.f32 %v85_v0  ;;  %384 = vset.pattern.permute.xlu2 %v492_v11  ;;  %383 = vset.pattern.permute.xlu1 %v492_v11  ;;  %61 = vst [vmem:[#allocation2 + $0x4] sm:$0x1] %v493_v20  ;;  %v62_v25 = vld [vmem:[#allocation7] sm:$0x7]  ;;  %v63_v26 = vld [vmem:[#allocation9] sm:$0xf] }
   0xf   :  { %v64_v27 = vmul.f32 %v62_v25, %v62_v25  ;;  %v73_v28 = vmul.f32 %v63_v26, %v63_v26  ;;  %83 = vst [vmem:[#allocation2] sm:$0x7] %v62_v25  ;;  %v123_v29 = vand.u32 127, %v122_v23  ;;  %vm65_vm0 = vcmask 1042432   ;;  %s495_s0 = smov [#allocation10]   ;;  %s331_s28 = sshll.u32 %s550_s3, 4  ;;  %s332_s28 = int_to_ptr.hbm [resolvable:$true] %s331_s28 }
  0x10   :  { %v88_v2 = vperm.slane %v86_v1, 0  ;;  %vm74_vm1 = vcmask 1043456   ;;  %v494_v53 = vmov 0.0   ;;  %s329_s2 = sshll.u32 %s495_s0, 4  ;;  %s330_s2 = int_to_ptr.vmem [resolvable:$true] %s329_s2 }
  0x11   :  { %v66_v30 = vsel %vm65_vm0, %v64_v27, 0.0  ;;  %v75_v31 = vsel %vm74_vm1, %v73_v28, 0.0  ;;  %v127_v34 = vcvt.s32.f32 %v123_v29  ;;  %60 = vst [vmem:[#allocation3] sm:$0x1f] %v494_v53 }
  0x12   :  { %90 = vxpose.xlu0.b32.start.end [1/1] (short) %v88_v2, 128  ;;  %v67_v32 = vrot.slane %v66_v30, 4  ;;  %v76_v33 = vrot.slane %v75_v31, 4 }
  0x14   :  { %v68_v37 = vadd.f32 %v67_v32, %v66_v30  ;;  %v77_v38 = vadd.f32 %v76_v33, %v75_v31 }
  0x16   :  { %v69_v40 = vrot.slane %v68_v37, 2  ;;  %v78_v41 = vrot.slane %v77_v38, 2 }
  0x18   :  { %v70_v42 = vadd.f32 %v69_v40, %v68_v37  ;;  %v79_v43 = vadd.f32 %v78_v41, %v77_v38  ;;  %v256_v61 = vld [vmem:[#allocation3] sm:$0x1f] }
  0x1a   :  { %v71_v44 = vrot.slane %v70_v42, 1  ;;  %v80_v45 = vrot.slane %v79_v43, 1 }
  0x1c   :  { %v72_v47 = vadd.f32 %v71_v44, %v70_v42  ;;  %v81_v48 = vadd.f32 %v80_v45, %v79_v43 }
  0x1e   :  { %v82_v50 = vadd.f32 %v81_v48, %v72_v47 }
  0x20   :  { %84 = vst [vmem:[#allocation2 + $0x3] sm:$0x1] %v82_v50 }
  0x27   :  { %v257_v60 = vld [vmem:[#allocation2] sm:$0x1f] }
  0x79   :  { %382 = vset.pattern.permute.xlu0 %v492_v11 }
  0xb6   :  { %v106_v3 = vpop.trf.xlu0 }
  0xbe   :  { %v107_v4 = vpop.trf.xlu0 }
  0xc6   :  { %v108_v5 = vpop.trf.xlu0 }
  0xce   :  { %v109_v6 = vpop.trf.xlu0 }
  0xd6   :  { %v110_v7 = vpop.trf.xlu0 }
  0xde   :  { %v111_v8 = vpop.trf.xlu0 }
  0xe6   :  { %v112_v9 = vpop.trf.xlu0 }
  0xee   :  { %v113_v10 = vpop.trf.xlu0 }
  0xf6   :  { %v114_v12 = vpop.trf.xlu0 }
  0xfe   :  { %v115_v13 = vpop.trf.xlu0 }
 0x106   :  { %v116_v14 = vpop.trf.xlu0 }
 0x10e   :  { %v117_v15 = vpop.trf.xlu0 }
 0x116   :  { %v118_v16 = vpop.trf.xlu0 }
 0x117   :  { %190 = vperm.xlu2 %384, %v118_v16  }
 0x11e   :  { %v119_v17 = vpop.trf.xlu0 }
 0x11f   :  { %185 = vperm.xlu2 %384, %v117_v15  }
 0x126   :  { %v120_v18 = vpop.trf.xlu0 }
 0x127   :  { %175 = vperm.xlu2 %384, %v115_v13   ;;  %200 = vperm.xlu1 %383, %v120_v18  }
 0x12e   :  { %v121_v19 = vpop.trf.xlu0 }
 0x12f   :  { %165 = vperm.xlu2 %384, %v113_v10   ;;  %195 = vperm.xlu1 %383, %v119_v17  }
 0x130   :  { %205 = vperm.xlu0 %382, %v121_v19  }
 0x137   :  { %155 = vperm.xlu2 %384, %v111_v8   ;;  %180 = vperm.xlu1 %383, %v116_v14  }
 0x13f   :  { %145 = vperm.xlu2 %384, %v109_v6   ;;  %170 = vperm.xlu1 %383, %v114_v12  }
 0x147   :  { %135 = vperm.xlu2 %384, %v107_v4   ;;  %160 = vperm.xlu1 %383, %v112_v9  }
 0x14f   :  { %150 = vperm.xlu1 %383, %v110_v7  }
 0x157   :  { %140 = vperm.xlu1 %383, %v108_v5  }
 0x15f   :  { %130 = vperm.xlu1 %383, %v106_v3  }
 0x171   :  { %v191_v21 = vpop.permute.xlu2 %190 }
 0x172   :  { %vm220_vm5 = vcmp.eq.f32.partialorder %v127_v34, %v191_v21 }
 0x179   :  { %v186_v22 = vpop.permute.xlu2 %185 }
 0x17a   :  { %vm219_vm6 = vcmp.eq.f32.partialorder %v127_v34, %v186_v22 }
 0x181   :  { %v176_v35 = vpop.permute.xlu2 %175 }
 0x182   :  { %vm217_vm8 = vcmp.eq.f32.partialorder %v127_v34, %v176_v35 }
 0x189   :  { %v166_v49 = vpop.permute.xlu2 %165 }
 0x18a   :  { %vm215_vm10 = vcmp.eq.f32.partialorder %v127_v34, %v166_v49 }
 0x191   :  { %v156_v52 = vpop.permute.xlu2 %155 }
 0x192   :  { %vm213_vm12 = vcmp.eq.f32.partialorder %v127_v34, %v156_v52 }
 0x199   :  { %v201_v24 = vpop.permute.xlu1 %200  ;;  %v146_v55 = vpop.permute.xlu2 %145 }
 0x19a   :  { %vm222_vm3 = vcmp.eq.f32.partialorder %v127_v34, %v201_v24  ;;  %vm211_vm14 = vcmp.eq.f32.partialorder %v127_v34, %v146_v55 }
 0x1a1   :  { %v196_v36 = vpop.permute.xlu1 %195  ;;  %v136_v57 = vpop.permute.xlu2 %135 }
 0x1a2   :  { %v206_v39 = vpop.permute.xlu0 %205  ;;  %vm221_vm4 = vcmp.eq.f32.partialorder %v127_v34, %v196_v36  ;;  %vm209_vm1 = vcmp.eq.f32.partialorder %v127_v34, %v136_v57 }
 0x1a3   :  { %vm223_vm2 = vcmp.eq.f32.partialorder %v127_v34, %v206_v39 }
 0x1a4   :  { %358 = vmatpush.msk.msra.mxu0 %vm223_vm2, %v493_v20 }
 0x1a6   :  { %359 = vmatpush.msk.msra.mxu0 %vm222_vm3, %v493_v20 }
 0x1a8   :  { %360 = vmatpush.msk.msra.mxu0 %vm221_vm4, %v493_v20 }
 0x1a9   :  { %v181_v46 = vpop.permute.xlu1 %180 }
 0x1aa   :  { %361 = vmatpush.msk.msra.mxu0 %vm220_vm5, %v493_v20  ;;  %vm218_vm7 = vcmp.eq.f32.partialorder %v127_v34, %v181_v46 }
 0x1ac   :  { %362 = vmatpush.msk.msra.mxu0 %vm219_vm6, %v493_v20 }
 0x1ae   :  { %363 = vmatpush.msk.msra.mxu0 %vm218_vm7, %v493_v20 }
 0x1b0   :  { %364 = vmatpush.msk.msra.mxu0 %vm217_vm8, %v493_v20 }
 0x1b1   :  { %v171_v51 = vpop.permute.xlu1 %170 }
 0x1b2   :  { %vm216_vm9 = vcmp.eq.f32.partialorder %v127_v34, %v171_v51 }
 0x1b3   :  { %365 = vmatpush.msk.msra.mxu0 %vm216_vm9, %v493_v20 }
 0x1b5   :  { %366 = vmatpush.msk.msra.mxu0 %vm215_vm10, %v493_v20 }
 0x1b9   :  { %v161_v54 = vpop.permute.xlu1 %160 }
 0x1ba   :  { %vm214_vm11 = vcmp.eq.f32.partialorder %v127_v34, %v161_v54 }
 0x1bb   :  { %367 = vmatpush.msk.msra.mxu0 %vm214_vm11, %v493_v20 }
 0x1bd   :  { %368 = vmatpush.msk.msra.mxu0 %vm213_vm12, %v493_v20 }
 0x1c1   :  { %v151_v56 = vpop.permute.xlu1 %150 }
 0x1c2   :  { %vm212_vm13 = vcmp.eq.f32.partialorder %v127_v34, %v151_v56 }
 0x1c3   :  { %369 = vmatpush.msk.msra.mxu0 %vm212_vm13, %v493_v20 }
 0x1c5   :  { %370 = vmatpush.msk.msra.mxu0 %vm211_vm14, %v493_v20 }
 0x1c9   :  { %v141_v58 = vpop.permute.xlu1 %140 }
 0x1ca   :  { %vm210_vm15 = vcmp.eq.f32.partialorder %v127_v34, %v141_v58 }
 0x1cb   :  { %371 = vmatpush.msk.msra.mxu0 %vm210_vm15, %v493_v20 }
 0x1cd   :  { %372 = vmatpush.msk.msra.mxu0 %vm209_vm1, %v493_v20 }
 0x1d1   :  { %v131_v59 = vpop.permute.xlu1 %130 }
 0x1d2   :  { %vm208_vm2 = vcmp.eq.f32.partialorder %v127_v34, %v131_v59 }
 0x1d3   :  { %373 = vmatpush.msk.msra.mxu0 %vm208_vm2, %v493_v20 }
 0x1d4   :  { %274 = vmatmul.f32.vlgmr.msra.gmra.mxu0 %v257_v60 }
 0x251   :  { %v275_v62 = vpop.f32.mrf.mxu0 }
 0x252   :  { %v278_v63 = vadd.f32 %v275_v62, %v256_v61 }
 0x254   :  { %279 = vst [vmem:[#allocation3] sm:$0x1f] %v278_v63 }
 0x25b   :  { %v283_v0 = vld [vmem:[#allocation3] sm:$0x1f] }
 0x25c   :  { %v284_v1 = vmax.f32 %v283_v0, 1.0  ;;  %v285_v2 = vmul.f32 %v283_v0, %v283_v0  ;;  %v374_v6 = vadd.f32 -1.0, %v283_v0  ;;  %v314_v13 = vmul.f32 4.0, %v283_v0 }
 0x25e   :  { %v286_v3 = vsel %vm65_vm0, %v285_v2, 0.0  ;;  %385 = vrcp.f32 %v284_v1  ;;  %v313_v11 = vmul.f32 3.0, %v374_v6  ;;  %v302_v14 = vand.u32 2147483647, %v284_v1 }
 0x25f   :  { %v287_v4 = vrot.slane %v286_v3, 4  ;;  %v304_v15 = vand.u32 2147483648, %v284_v1  ;;  %vm298_vm4 = vweird.f32 %v284_v1 }
 0x260   :  { %v315_v18 = vadd.f32 %v314_v13, %v313_v11  ;;  %vm303_vm5 = vcmp.eq.f32.partialorder %v302_v14, 8.507059e+37 }
 0x261   :  { %v288_v5 = vadd.f32 %v287_v4, %v286_v3  ;;  %v305_v20 = vor.u32 1.1754944e-38, %v304_v15 }
 0x262   :  { %v317_v23 = vmul.f32 0.5, %v315_v18 }
 0x263   :  { %v289_v7 = vrot.slane %v288_v5, 2 }
 0x264   :  { %v386_v8 = vpop.eup %385  ;;  %v318_v27 = vmul.f32 1.837877, %v317_v23 }
 0x265   :  { %v290_v9 = vadd.f32 %v289_v7, %v288_v5  ;;  %v294_v10 = vmul.f32 %v386_v8, %v284_v1  ;;  %vm299_vm3 = vweird.f32 %v386_v8 }
 0x266   :  { %vm300_vm0 = vmor %vm298_vm4, %vm299_vm3  ;;  %v320_v30 = vrot.slane %v318_v27, 1 }
 0x267   :  { %v295_v12 = vsub.f32 1.0, %v294_v10  ;;  %v291_v16 = vrot.slane %v290_v9, 1 }
 0x269   :  { %v296_v17 = vmul.f32 %v386_v8, %v295_v12  ;;  %v292_v21 = vadd.f32 %v291_v16, %v290_v9 }
 0x26b   :  { %v297_v19 = vadd.f32 %v386_v8, %v296_v17 }
 0x26d   :  { %v301_v22 = vsel %vm300_vm0, %v386_v8, %v297_v19 }
 0x26e   :  { %v306_v24 = vsel %vm303_vm5, %v305_v20, %v301_v22 }
 0x26f   :  { %v307_v25 = vmul.f32 %v306_v24, %v292_v21 }
 0x271   :  { %v309_v26 = vrot.slane %v307_v25, 1 }
 0x273   :  { %v311_v28 = vsub.f32 %v283_v0, %v309_v26 }
 0x275   :  { %v316_v29 = vmul.f32 -0.5, %v311_v28 }
 0x277   :  { %v322_v31 = vsub.f32 %v316_v29, %v320_v30 }
 0x279   :  { %323 = vst [vmem:[#allocation10 - $0x3] sm:$0x8] %v322_v31 }
 0x27a   :  { %334 = dma.vmem_to_hbm [thread:$0]  %s330_s2, 16, %s332_s28, [#allocation6]  }
 0x27b   :  { %487 = dma.done.wait [#allocation6], 16  }
 0x27c   :  { %488 = vsyncadd [#allocation6], 4294967280 }
 0x27d   :  { %339 = vsyncpa [#allocation5], 1 }
 0x27e   :  { %340 = vsyncpa [#allocation8], 1 }
 0x27f   :  { %341 = vsyncpa [#allocation6], 1 }

</bundles_post_ra>
